<compile_context>
chip_gen: v7x
topology: tpu7x:2x2x1
jax: 0.10.0
libtpu: 0.0.40
codegen_flags: <defaults>
</compile_context>

<pallas_src>
import jax
import jax.numpy as jnp
from jax.experimental import pallas as pl
from jax.experimental.pallas import tpu as pltpu

# int8 bit type
QMIN = -128.0
QMAX = 127.0
EPS = 1.1920928955078125e-07  # torch.finfo(torch.float32).eps

LANE = 128
SUBLANE = 8
MAX_WIDTH = 8192                      # lane-dense slab width cap
VMEM_BLOCK_BYTES = 4 * 1024 * 1024    # ~4 MiB per input block
VMEM_LIMIT_BYTES = 32 * 1024 * 1024   # 2x4MiB in + 2x4MiB out double-buffered


# ---------------------------------------------------------------------------
# Layout planning: lane-dense 2-D slab + row tiling
# ---------------------------------------------------------------------------
def _plan_layout(total, itemsize):
    """Pick a lane-dense 2-D slab (rows, width) and a row tile for it."""
    if total % LANE != 0:
        # TODO(synk): general shapes need a padded tail tile with masked
        # stores (pltpu.store with mask); demo shapes are multiples of 128.
        raise ValueError("element count must be a multiple of 128")
    # Widest multiple of 128 (<= MAX_WIDTH) that divides the element count.
    width = LANE
    w = (min(total, MAX_WIDTH) // LANE) * LANE
    while w >= LANE:
        if total % w == 0:
            width = w
            break
        w -= LANE
    rows = total // width
    # Whole slab in one block if it fits the per-block budget (or rows can't
    # be tiled by 8); otherwise the largest multiple of 8 dividing rows that
    # stays under the budget.
    rows_budget = max(1, VMEM_BLOCK_BYTES // (width * itemsize))
    if rows <= rows_budget or rows % SUBLANE != 0:
        row_tile = rows
    else:
        row_tile = max(SUBLANE, (rows_budget // SUBLANE) * SUBLANE)
        while rows % row_tile != 0:
            row_tile -= SUBLANE
    return rows, width, row_tile


# ---------------------------------------------------------------------------
# Fused kernel: phase 0 = layer-wise minmax + param derivation,
#               phase 1 = uniform fake-quantize
# ---------------------------------------------------------------------------
def _qact_fused_kernel(x_ref, o_ref, min_ref, max_ref, params_ref):
    phase = pl.program_id(0)
    i = pl.program_id(1)
    n_tiles = pl.num_programs(1)

    # ---- phase 0: streaming layer-wise min/max reduction -----------------
    @pl.when(phase == 0)
    def _():
        x = x_ref[...].astype(jnp.float32)
        # Row-reduce the tile to a (1, W) partial, then elementwise-accumulate
        # into the lane-parallel VMEM scratch (VPU work; no loop-carried SMEM
        # scalar RMW, so tiles pipeline cleanly under the DMA stream).
        tmin = jnp.min(x, axis=0, keepdims=True)
        tmax = jnp.max(x, axis=0, keepdims=True)

        @pl.when(i == 0)
        def _():
            min_ref[...] = tmin
            max_ref[...] = tmax

        @pl.when(i > 0)
        def _():
            min_ref[...] = jnp.minimum(min_ref[...], tmin)
            max_ref[...] = jnp.maximum(max_ref[...], tmax)

        # Last phase-0 step: single cross-lane reduce to scalars, then derive
        # scale / zero_point (update_quantization_params) into SMEM scratch.
        @pl.when(i == n_tiles - 1)
        def _():
            min_val = jnp.min(min_ref[...])
            max_val = jnp.max(max_ref[...])
            scale = jnp.maximum((max_val - min_val) / (QMAX - QMIN), EPS)
            zero_point = jnp.clip(QMIN - jnp.round(min_val / scale),
                                  QMIN, QMAX)
            params_ref[0] = scale
            params_ref[1] = zero_point

    # ---- phase 1: uniform fake-quantize (quant + dequant) -----------------
    @pl.when(phase == 1)
    def _():
        scale = params_ref[0]
        zp = params_ref[1]
        x = x_ref[...].astype(jnp.float32)
        # Exact x / scale keeps rounding identical to torch.round(x / scale).
        xq = jnp.clip(jnp.round(x / scale + zp), QMIN, QMAX)
        o_ref[...] = ((xq - zp) * scale).astype(o_ref.dtype)


def _qact_calibrate_quantize(x2d, row_tile):
    rows, width = x2d.shape
    n_tiles = rows // row_tile
    return pl.pallas_call(
        _qact_fused_kernel,
        out_shape=jax.ShapeDtypeStruct((rows, width), x2d.dtype),
        grid_spec=pltpu.PrefetchScalarGridSpec(
            num_scalar_prefetch=0,
            grid=(2, n_tiles),
            in_specs=[pl.BlockSpec((row_tile, width), lambda p, i: (i, 0))],
            # Pin the output block to 0 during phase 0 (i*p == 0), so no
            # writeback happens until phase 1 has produced real data.  For a
            # single-block slab this also collapses to 1 read + 1 write.
            out_specs=pl.BlockSpec((row_tile, width),
                                   lambda p, i: (i * p, 0)),
            scratch_shapes=[
                pltpu.VMEM((1, width), jnp.float32),   # running min (per lane)
                pltpu.VMEM((1, width), jnp.float32),   # running max (per lane)
                pltpu.SMEM((2,), jnp.float32),         # [scale, zero_point]
            ],
        ),
        compiler_params=pltpu.CompilerParams(
            dimension_semantics=("arbitrary", "arbitrary"),
            vmem_limit_bytes=VMEM_LIMIT_BYTES,
        ),
    )(x2d)


# ---------------------------------------------------------------------------
# Standalone fake-quant (quant=True with already-calibrated scale/zero_point)
# ---------------------------------------------------------------------------
def _fakequant_kernel(params_ref, x_ref, o_ref):
    scale = params_ref[0]
    zp = params_ref[1]
    x = x_ref[...].astype(jnp.float32)
    xq = jnp.clip(jnp.round(x / scale + zp), QMIN, QMAX)
    o_ref[...] = ((xq - zp) * scale).astype(o_ref.dtype)


def _fakequant(x2d, row_tile, scale, zero_point):
    rows, width = x2d.shape
    params = jnp.stack([
        jnp.asarray(scale, dtype=jnp.float32).reshape(()),
        jnp.asarray(zero_point, dtype=jnp.float32).reshape(()),
    ])
    return pl.pallas_call(
        _fakequant_kernel,
        out_shape=jax.ShapeDtypeStruct((rows, width), x2d.dtype),
        grid_spec=pltpu.PrefetchScalarGridSpec(
            num_scalar_prefetch=0,
            grid=(rows // row_tile,),
            in_specs=[
                pl.BlockSpec(memory_space=pltpu.SMEM),  # [scale, zero_point]
                pl.BlockSpec((row_tile, width), lambda i: (i, 0)),
            ],
            out_specs=pl.BlockSpec((row_tile, width), lambda i: (i, 0)),
        ),
        compiler_params=pltpu.CompilerParams(
            dimension_semantics=("parallel",),
            vmem_limit_bytes=VMEM_LIMIT_BYTES,
        ),
    )(params, x2d)


# ---------------------------------------------------------------------------
# QAct forward
# ---------------------------------------------------------------------------
def qact_forward(x, *, quant=True, calibrate=True, last_calibrate=True,
                 scale=None, zero_point=None):
    """Forward pass of QAct (functional).

    calibrate + last_calibrate: layer-wise minmax observer + param update +
    fake-quant, fused into one Pallas launch.  Otherwise quantize with the
    provided scale / zero_point.
    """
    if not quant:
        # TODO(synk): the PyTorch observer keeps running min/max state across
        # calibration batches (module buffers); this functional port only
        # implements the single-shot last_calibrate path.
        return x

    orig_shape = x.shape
    rows, width, row_tile = _plan_layout(x.size, x.dtype.itemsize)
    x2d = x.reshape(rows, width)

    if calibrate and last_calibrate:
        out2d = _qact_calibrate_quantize(x2d, row_tile)
    else:
        assert scale is not None and zero_point is not None, \
            "non-calibrated quantization needs scale and zero_point"
        out2d = _fakequant(x2d, row_tile, scale, zero_point)

    return out2d.reshape(orig_shape)


# ---------------------------------------------------------------------------
if __name__ == "__main__":
    key = jax.random.PRNGKey(0)
    # NCHW activation, small shape
    x = jax.random.normal(key, (2, 4, 16, 16), dtype=jnp.float32) * 3.0

    out = qact_forward(x, quant=True, calibrate=True, last_calibrate=True)
    out = jax.block_until_ready(out)

    # pure-JAX reference (FQ-ViT int8 layer-wise minmax uniform fake-quant)
    mn, mx = jnp.min(x), jnp.max(x)
    s = jnp.maximum((mx - mn) / (QMAX - QMIN), EPS)
    zp = jnp.clip(QMIN - jnp.round(mn / s), QMIN, QMAX)
    ref = (jnp.clip(jnp.round(x / s + zp), QMIN, QMAX) - zp) * s

    assert out.shape == x.shape and out.dtype == x.dtype
    assert jnp.allclose(out, ref, atol=1e-5, rtol=1e-5)

    print("KERNEL_OK")
</pallas_src>

<mosaic_0001>
module attributes {stable_mosaic.version = 11 : i64} {
  func.func @_qact_fused_kernel(%arg0: i32, %arg1: i32, %arg2: memref<1x2048xf32, #tpu.memory_space<vmem>>, %arg3: memref<1x2048xf32, #tpu.memory_space<vmem>>, %arg4: memref<1x2048xf32, #tpu.memory_space<vmem>>, %arg5: memref<1x2048xf32, #tpu.memory_space<vmem>>, %arg6: memref<2xf32, #tpu.memory_space<smem>>) attributes {dimension_semantics = [#tpu.dimension_semantics<arbitrary>, #tpu.dimension_semantics<arbitrary>], iteration_bounds = array<i64: 2, 1>, scalar_prefetch = 0 : i64, scratch_operands = 3 : i64, tpu.core_type = #tpu.core_type<tc>, window_params = [{transform_indices = @transform_0, window_bounds = array<i64: 1, 2048>}, {transform_indices = @transform_1, window_bounds = array<i64: 1, 2048>}]} {
    %c0_i32 = arith.constant 0 : i32
    %0 = arith.cmpi eq, %arg0, %c0_i32 : i32
    %1 = arith.extui %0 : i1 to i32
    %c0_i32_0 = arith.constant 0 : i32
    %2 = arith.cmpi ne, %1, %c0_i32_0 : i32
    scf.if %2 {
      %c0 = arith.constant 0 : index
      %c0_2 = arith.constant 0 : index
      %6 = vector.load %arg2[%c0, %c0_2] : memref<1x2048xf32, #tpu.memory_space<vmem>>, vector<1x2048xf32>
      %cst = arith.constant dense<0x7F800000> : vector<2048xf32>
      %7 = vector.multi_reduction <minimumf>, %6, %cst [0] : vector<1x2048xf32> to vector<2048xf32>
      %8 = vector.shape_cast %7 : vector<2048xf32> to vector<1x2048xf32>
      %cst_3 = arith.constant dense<0xFF800000> : vector<2048xf32>
      %9 = vector.multi_reduction <maximumf>, %6, %cst_3 [0] : vector<1x2048xf32> to vector<2048xf32>
      %10 = vector.shape_cast %9 : vector<2048xf32> to vector<1x2048xf32>
      %c0_i32_4 = arith.constant 0 : i32
      %11 = arith.cmpi eq, %arg1, %c0_i32_4 : i32
      %12 = arith.extui %11 : i1 to i32
      %c0_i32_5 = arith.constant 0 : i32
      %13 = arith.cmpi ne, %12, %c0_i32_5 : i32
      scf.if %13 {
        %c0_10 = arith.constant 0 : index
        %c0_11 = arith.constant 0 : index
        %20 = vector.load %arg4[%c0_10, %c0_11] : memref<1x2048xf32, #tpu.memory_space<vmem>>, vector<1x2048xf32>
        tpu.vector_store %arg4[%c0_10, %c0_11], %8 {strides = array<i32>} : memref<1x2048xf32, #tpu.memory_space<vmem>>, vector<1x2048xf32>,
        %c0_12 = arith.constant 0 : index
        %c0_13 = arith.constant 0 : index
        %21 = vector.load %arg5[%c0_12, %c0_13] : memref<1x2048xf32, #tpu.memory_space<vmem>>, vector<1x2048xf32>
        tpu.vector_store %arg5[%c0_12, %c0_13], %10 {strides = array<i32>} : memref<1x2048xf32, #tpu.memory_space<vmem>>, vector<1x2048xf32>,
      } else {
      }
      %c0_i32_6 = arith.constant 0 : i32
      %14 = arith.cmpi sgt, %arg1, %c0_i32_6 : i32
      %15 = arith.extui %14 : i1 to i32
      %c0_i32_7 = arith.constant 0 : i32
      %16 = arith.cmpi ne, %15, %c0_i32_7 : i32
      scf.if %16 {
        %c0_10 = arith.constant 0 : index
        %c0_11 = arith.constant 0 : index
        %20 = vector.load %arg4[%c0_10, %c0_11] : memref<1x2048xf32, #tpu.memory_space<vmem>>, vector<1x2048xf32>
        %21 = arith.minimumf %20, %8 : vector<1x2048xf32>
        %c0_12 = arith.constant 0 : index
        %c0_13 = arith.constant 0 : index
        %22 = vector.load %arg4[%c0_12, %c0_13] : memref<1x2048xf32, #tpu.memory_space<vmem>>, vector<1x2048xf32>
        tpu.vector_store %arg4[%c0_12, %c0_13], %21 {strides = array<i32>} : memref<1x2048xf32, #tpu.memory_space<vmem>>, vector<1x2048xf32>,
        %c0_14 = arith.constant 0 : index
        %c0_15 = arith.constant 0 : index
        %23 = vector.load %arg5[%c0_14, %c0_15] : memref<1x2048xf32, #tpu.memory_space<vmem>>, vector<1x2048xf32>
        %24 = arith.maximumf %23, %10 : vector<1x2048xf32>
        %c0_16 = arith.constant 0 : index
        %c0_17 = arith.constant 0 : index
        %25 = vector.load %arg5[%c0_16, %c0_17] : memref<1x2048xf32, #tpu.memory_space<vmem>>, vector<1x2048xf32>
        tpu.vector_store %arg5[%c0_16, %c0_17], %24 {strides = array<i32>} : memref<1x2048xf32, #tpu.memory_space<vmem>>, vector<1x2048xf32>,
      } else {
      }
      %c0_i32_8 = arith.constant 0 : i32
      %17 = arith.cmpi eq, %arg1, %c0_i32_8 : i32
      %18 = arith.extui %17 : i1 to i32
      %c0_i32_9 = arith.constant 0 : i32
      %19 = arith.cmpi ne, %18, %c0_i32_9 : i32
      scf.if %19 {
        %c0_10 = arith.constant 0 : index
        %c0_11 = arith.constant 0 : index
        %20 = vector.load %arg4[%c0_10, %c0_11] : memref<1x2048xf32, #tpu.memory_space<vmem>>, vector<1x2048xf32>
        %21 = vector.shape_cast %20 : vector<1x2048xf32> to vector<1x1x2048xf32>
        %cst_12 = arith.constant dense<0x7F800000> : vector<1xf32>
        %22 = vector.multi_reduction <minimumf>, %21, %cst_12 [1, 2] : vector<1x1x2048xf32> to vector<1xf32>
        %23 = vector.shape_cast %22 : vector<1xf32> to vector<1x1x1xf32>
        %24 = vector.extract %23[0, 0, 0] : f32 from vector<1x1x1xf32>
        %c0_13 = arith.constant 0 : index
        %c0_14 = arith.constant 0 : index
        %25 = vector.load %arg5[%c0_13, %c0_14] : memref<1x2048xf32, #tpu.memory_space<vmem>>, vector<1x2048xf32>
        %26 = vector.shape_cast %25 : vector<1x2048xf32> to vector<1x1x2048xf32>
        %cst_15 = arith.constant dense<0xFF800000> : vector<1xf32>
        %27 = vector.multi_reduction <maximumf>, %26, %cst_15 [1, 2] : vector<1x1x2048xf32> to vector<1xf32>
        %28 = vector.shape_cast %27 : vector<1xf32> to vector<1x1x1xf32>
        %29 = vector.extract %28[0, 0, 0] : f32 from vector<1x1x1xf32>
        %30 = arith.subf %29, %24 : f32
        %cst_16 = arith.constant 2.550000e+02 : f32
        %31 = arith.divf %30, %cst_16 : f32
        %cst_17 = arith.constant 1.1920929E-7 : f32
        %32 = arith.maximumf %31, %cst_17 : f32
        %33 = arith.divf %24, %32 : f32
        %34 = math.roundeven %33 : f32
        %cst_18 = arith.constant -1.280000e+02 : f32
        %35 = arith.subf %cst_18, %34 : f32
        %cst_19 = arith.constant -1.280000e+02 : f32
        %cst_20 = arith.constant 1.270000e+02 : f32
        %36 = arith.maximumf %cst_19, %35 : f32
        %37 = arith.minimumf %cst_20, %36 : f32
        %c0_21 = arith.constant 0 : index
        %38 = memref.load %arg6[%c0_21] : memref<2xf32, #tpu.memory_space<smem>>
        memref.store %32, %arg6[%c0_21] : memref<2xf32, #tpu.memory_space<smem>>
        %c1 = arith.constant 1 : index
        %39 = memref.load %arg6[%c1] : memref<2xf32, #tpu.memory_space<smem>>
        memref.store %37, %arg6[%c1] : memref<2xf32, #tpu.memory_space<smem>>
      } else {
      }
    } else {
    }
    %c1_i32 = arith.constant 1 : i32
    %3 = arith.cmpi eq, %arg0, %c1_i32 : i32
    %4 = arith.extui %3 : i1 to i32
    %c0_i32_1 = arith.constant 0 : i32
    %5 = arith.cmpi ne, %4, %c0_i32_1 : i32
    scf.if %5 {
      %c0 = arith.constant 0 : index
      %6 = memref.load %arg6[%c0] : memref<2xf32, #tpu.memory_space<smem>>
      %c1 = arith.constant 1 : index
      %7 = memref.load %arg6[%c1] : memref<2xf32, #tpu.memory_space<smem>>
      %c0_2 = arith.constant 0 : index
      %c0_3 = arith.constant 0 : index
      %8 = vector.load %arg2[%c0_2, %c0_3] : memref<1x2048xf32, #tpu.memory_space<vmem>>, vector<1x2048xf32>
      %9 = vector.broadcast %6 : f32 to vector<1x2048xf32>
      %10 = arith.divf %8, %9 : vector<1x2048xf32>
      %11 = vector.broadcast %7 : f32 to vector<1x2048xf32>
      %12 = arith.addf %10, %11 : vector<1x2048xf32>
      %13 = math.roundeven %12 : vector<1x2048xf32>
      %cst = arith.constant -1.280000e+02 : f32
      %cst_4 = arith.constant 1.270000e+02 : f32
      %14 = vector.broadcast %cst : f32 to vector<1x2048xf32>
      %15 = arith.maximumf %14, %13 : vector<1x2048xf32>
      %16 = vector.broadcast %cst_4 : f32 to vector<1x2048xf32>
      %17 = arith.minimumf %16, %15 : vector<1x2048xf32>
      %18 = vector.broadcast %7 : f32 to vector<1x2048xf32>
      %19 = arith.subf %17, %18 : vector<1x2048xf32>
      %20 = vector.broadcast %6 : f32 to vector<1x2048xf32>
      %21 = arith.mulf %19, %20 : vector<1x2048xf32>
      %c0_5 = arith.constant 0 : index
      %c0_6 = arith.constant 0 : index
      %22 = vector.load %arg3[%c0_5, %c0_6] : memref<1x2048xf32, #tpu.memory_space<vmem>>, vector<1x2048xf32>
      tpu.vector_store %arg3[%c0_5, %c0_6], %21 {strides = array<i32>} : memref<1x2048xf32, #tpu.memory_space<vmem>>, vector<1x2048xf32>,
    } else {
    }
    return
  }
  func.func @transform_0(%arg0: i32, %arg1: i32) -> (i32, i32) {
    %c0_i32 = arith.constant 0 : i32
    %c0_i32_0 = arith.constant 0 : i32
    return %arg1, %c0_i32 : i32, i32
  }
  func.func @transform_1(%arg0: i32, %arg1: i32) -> (i32, i32) {
    %0 = arith.muli %arg1, %arg0 : i32
    %c0_i32 = arith.constant 0 : i32
    %c0_i32_0 = arith.constant 0 : i32
    return %0, %c0_i32 : i32, i32
  }
}

</mosaic_0001>

<bundles_post_ra>
// kernel: tpu_custom_call.1
= control target key start
LH: loop header
LB: loop body
LE: loop exit
PB: predicated region body
PF: predicated region fallthrough
CT: control target
= control target key end

     0   :  { %6 = vsyncpa [#allocation6], 0  ;;  %s857_s0 = inlined_call_operand.hbm [shape: f32[1,2048], index: 0, kind: input, shape index: {}]   ;;  %s858_s1 = inlined_call_operand.hbm [shape: f32[1,2048], index: 1, kind: output, shape index: {}]  }
   0x1   :  { %7 = vsyncpa [#allocation7], 0 }
   0x2   :  { %9 = vsyncpa [#allocation7 + $0x1], 0  ;;  %s725_s6 = smov 0   ;;  %s727_s7 = smov 0  }
   0x3   :  { %s729_s8 = smov 0  }
   0x4 LB: > { %s549_s9 = sadd.s32 4294967295, %s708_s8   ;;  %s550_s10 = sadd.s32 4294967294, %s708_s8   ;;  %s708_s8 = sphi %s729_s8, %s15_s8   ;;  %s704_s7 = sphi %s727_s7, %s869_s7   ;;  %s700_s6 = sphi %s725_s6, %s868_s6  }
   0x5   : > { %s27_s11 = sadd.s32 1, %s704_s7  ;;  %p551_p0 = scmp.ge.s32.totalorder %s708_s8, 1 }
   0x6   : > { %p29_p1 = scmp.ge.s32.totalorder %s27_s11, 2  ;;  %p86_p2 = scmp.lt.s32.totalorder %s708_s8, 3 }
   0x7   : > { %p747_p3 = scmp.eq.s32.totalorder %s549_s9, 0  ;;  %s710_s14 = smov [#allocation5]  }
   0x8   : > { %s871_s11 = smov (%p29_p1, %s27_s11), 0  ;;  %p753_p4 = pnand %p551_p0, %p86_p2 }
   0x9   : > { %s862_s12 = scalar_select %p747_p3, 1, 0 }
   0xa   : > { %s863_s13 = scalar_select %p753_p4, 1, 0 }
   0xb   : > { %s102_s15 = sshll.u32 %s710_s14, 4  ;;  %p578_p5 = pneg %p753_p4  ;;  %s103_s15 = int_to_ptr.vmem [resolvable:$true] %s102_s15 }
   0xc   : > { %s624_s19 = scalar_lea.hbm %s857_s0, 256 }
   0xd   : > { %p761_p6 = pnand %p747_p3, %p578_p5  ;;  %p625_p7 = scmp.ne.s32.totalorder %s857_s0, %s624_s19 }
   0xe   : > { %p631_p11 = scmp.lt.u32.totalorder %s624_s19, %s857_s0 }
   0xf   : > { %p626_p8 = pneg %p761_p6 }
  0x11   : > { %p627_p9 = pnand %p626_p8, %p625_p7 }
  0x13   : > { %p628_p10 = pneg %p627_p9 }
  0x15   : > { %p633_p12 = pnand %p631_p11, %p628_p10 }
  0x17   : > { %636 = shalt.err (!%p633_p12)
}
  0x18   : > { %s637_s24 = scalar_lea.vmem %s103_s15, 256  ;;  %p645_p2 = scmp.lt.s32.totalorder %s103_s15, %s103_s15 }
  0x19   : > { %p638_p13 = scmp.ne.s32.totalorder %s103_s15, %s637_s24  ;;  %p646_p5 = scmp.lt.s32.totalorder %s637_s24, %s637_s24 }
  0x1b   : > { %p640_p0 = pnand %p638_p13, %p626_p8  ;;  %p647_p3 = por %p646_p5, %p645_p2 }
  0x1d   : > { %p641_p1 = pneg %p640_p0 }
  0x1f   : > { %p648_p4 = pnand %p647_p3, %p641_p1 }
  0x21   : > { %651 = shalt.err (!%p648_p4)
}
  0x22   : > { %581 = dma.hbm_to_vmem [thread:$0]  (!%p761_p6), %s857_s0, 256, %s103_s15, [#allocation6]  }
  0x23   : > { %p865_p7 = scmp.ne.s32.totalorder %s863_s13, 0 }
  0x24   : > { %p866_p9 = scmp.ne.s32.totalorder (!%p865_p7), %s862_s12, 0 }
  0x25   : > { %115 = sbr.rel (%p865_p7) target bundleno = 418 (0x1a2), region = 24 }
  0x2c   : > { %691 = dma.done.wait (%p866_p9), [#allocation6], 256  }
  0x2d   : > { %693 = vsyncadd (%p866_p9), [#allocation6], 4294967040  ;;  %p555_p8 = scmp.ne.s32.totalorder %s700_s6, 0 }
  0x2e   : > { %v168_v0 = vlaneseq (!%p555_p8)  ;;  %v135_v2 = vld [vmem:[#allocation5] sm:$0xff] (!%p555_p8)  ;;  %vm248_vm0 = vcmask (!%p555_p8), 1040384   ;;  %v136_v7 = vld [vmem:[#allocation5 + $0x8] sm:$0xff] (!%p555_p8)  ;;  %s711_s2 = smov (!%p555_p8), 1.1920929e-07   ;;  %s712_s19 = smov (!%p555_p8), -128.0  }
  0x2f   : > { %134 = sbr.rel (%p555_p8) target bundleno = 361 (0x169), region = 32  ;;  %s713_s21 = smov (!%p555_p8), 127.0  }
  0x30   : > { %v169_v1 = vshrl.u32 (!%p555_p8), %v168_v0, 7 }
  0x32   : > { %v170_v3 = vsub.s32 (!%p555_p8), 0, %v169_v1  ;;  %v174_v4 = vsub.s32 (!%p555_p8), 1, %v169_v1  ;;  %v178_v5 = vsub.s32 (!%p555_p8), 2, %v169_v1  ;;  %v182_v6 = vsub.s32 (!%p555_p8), 3, %v169_v1 }
  0x33   : > { %v186_v8 = vsub.s32 (!%p555_p8), 4, %v169_v1  ;;  %v190_v9 = vsub.s32 (!%p555_p8), 5, %v169_v1  ;;  %v194_v10 = vsub.s32 (!%p555_p8), 6, %v169_v1  ;;  %v198_v11 = vsub.s32 (!%p555_p8), 7, %v169_v1 }
  0x34   : > { %v171_v12 = vrot.slane (!%p555_p8), %v135_v2, %v170_v3  ;;  %v175_v13 = vrot.slane (!%p555_p8), %v135_v2, %v174_v4  ;;  %v179_v14 = vrot.slane (!%p555_p8), %v135_v2, %v178_v5  ;;  %v183_v15 = vrot.slane (!%p555_p8), %v135_v2, %v182_v6 }
  0x35   : > { %v187_v16 = vrot.slane (!%p555_p8), %v135_v2, %v186_v8  ;;  %v191_v17 = vrot.slane (!%p555_p8), %v135_v2, %v190_v9  ;;  %v195_v18 = vrot.slane (!%p555_p8), %v135_v2, %v194_v10  ;;  %v199_v19 = vrot.slane (!%p555_p8), %v135_v2, %v198_v11 }
  0x36   : > { %v203_v20 = vrot.slane %v136_v7, %v170_v3  ;;  %v207_v21 = vrot.slane %v136_v7, %v174_v4  ;;  %v211_v22 = vrot.slane %v136_v7, %v178_v5  ;;  %v215_v23 = vrot.slane %v136_v7, %v182_v6 }
  0x37   : > { %v219_v24 = vrot.slane %v136_v7, %v186_v8  ;;  %v223_v25 = vrot.slane %v136_v7, %v190_v9  ;;  %v227_v26 = vrot.slane %v136_v7, %v194_v10  ;;  %v231_v27 = vrot.slane %v136_v7, %v198_v11 }
  0x38   : > { %v249_v28 = vsel %vm248_vm0, %v171_v12, inf  ;;  %v250_v29 = vsel %vm248_vm0, %v175_v13, inf  ;;  %v251_v30 = vsel %vm248_vm0, %v179_v14, inf  ;;  %v252_v31 = vsel %vm248_vm0, %v183_v15, inf }
  0x39   : > { %v253_v32 = vsel %vm248_vm0, %v187_v16, inf  ;;  %v255_v33 = vsel %vm248_vm0, %v191_v17, inf  ;;  %v257_v34 = vsel %vm248_vm0, %v195_v18, inf  ;;  %v259_v35 = vsel %vm248_vm0, %v199_v19, inf }
  0x3a   : > { %v254_v36 = vmin.f32 %v249_v28, %v253_v32  ;;  %v256_v37 = vmin.f32 %v250_v29, %v255_v33  ;;  %v258_v38 = vmin.f32 %v251_v30, %v257_v34  ;;  %v260_v39 = vmin.f32 %v252_v31, %v259_v35 }
  0x3b   : > { %v261_v40 = vsel %vm248_vm0, %v203_v20, inf  ;;  %v263_v41 = vsel %vm248_vm0, %v207_v21, inf  ;;  %v265_v42 = vsel %vm248_vm0, %v211_v22, inf  ;;  %v267_v43 = vsel %vm248_vm0, %v215_v23, inf }
  0x3c   : > { %v262_v44 = vmin.f32 %v254_v36, %v261_v40  ;;  %v264_v45 = vmin.f32 %v256_v37, %v263_v41  ;;  %v266_v46 = vmin.f32 %v258_v38, %v265_v42  ;;  %v268_v47 = vmin.f32 %v260_v39, %v267_v43 }
  0x3d   : > { %v269_v48 = vsel %vm248_vm0, %v219_v24, inf  ;;  %v271_v49 = vsel %vm248_vm0, %v223_v25, inf  ;;  %v273_v50 = vsel %vm248_vm0, %v227_v26, inf  ;;  %v275_v51 = vsel %vm248_vm0, %v231_v27, inf }
  0x3e   : > { %v270_v52 = vmin.f32 %v262_v44, %v269_v48  ;;  %v272_v53 = vmin.f32 %v264_v45, %v271_v49  ;;  %v274_v54 = vmin.f32 %v266_v46, %v273_v50  ;;  %v276_v55 = vmin.f32 %v268_v47, %v275_v51 }
  0x3f   : > { %v373_v56 = vsel %vm248_vm0, %v171_v12, -inf  ;;  %v374_v57 = vsel %vm248_vm0, %v175_v13, -inf  ;;  %v375_v58 = vsel %vm248_vm0, %v179_v14, -inf  ;;  %v376_v59 = vsel %vm248_vm0, %v183_v15, -inf }
  0x40   : > { %v277_v60 = vmin.f32 %v270_v52, %v272_v53  ;;  %v278_v61 = vmin.f32 %v274_v54, %v276_v55  ;;  %v377_v62 = vsel %vm248_vm0, %v187_v16, -inf  ;;  %v379_v63 = vsel %vm248_vm0, %v191_v17, -inf }
  0x41   : > { %v378_v0 = vmax.f32 %v373_v56, %v377_v62  ;;  %v380_v1 = vmax.f32 %v374_v57, %v379_v63  ;;  %v381_v2 = vsel %vm248_vm0, %v195_v18, -inf  ;;  %v383_v3 = vsel %vm248_vm0, %v199_v19, -inf }
  0x42   : > { %v279_v4 = vmin.f32 %v277_v60, %v278_v61  ;;  %v382_v5 = vmax.f32 %v375_v58, %v381_v2  ;;  %v384_v6 = vmax.f32 %v376_v59, %v383_v3  ;;  %v385_v7 = vsel %vm248_vm0, %v203_v20, -inf }
  0x43   : > { %v386_v8 = vmax.f32 %v378_v0, %v385_v7  ;;  %v387_v9 = vsel %vm248_vm0, %v207_v21, -inf  ;;  %v389_v10 = vsel %vm248_vm0, %v211_v22, -inf  ;;  %v391_v11 = vsel %vm248_vm0, %v215_v23, -inf }
  0x44   : > { %280 = vmin.xlane.f32.xlu0 %v279_v4  ;;  %v388_v12 = vmax.f32 %v380_v1, %v387_v9  ;;  %v390_v13 = vmax.f32 %v382_v5, %v389_v10  ;;  %v392_v14 = vmax.f32 %v384_v6, %v391_v11  ;;  %v393_v15 = vsel %vm248_vm0, %v219_v24, -inf }
  0x45   : > { %v394_v16 = vmax.f32 %v386_v8, %v393_v15  ;;  %v395_v17 = vsel %vm248_vm0, %v223_v25, -inf  ;;  %v397_v18 = vsel %vm248_vm0, %v227_v26, -inf  ;;  %v399_v19 = vsel %vm248_vm0, %v231_v27, -inf }
  0x46   : > { %v396_v20 = vmax.f32 %v388_v12, %v395_v17  ;;  %v398_v28 = vmax.f32 %v390_v13, %v397_v18  ;;  %v400_v21 = vmax.f32 %v392_v14, %v399_v19 }
  0x48   : > { %v401_v29 = vmax.f32 %v394_v16, %v396_v20  ;;  %v402_v22 = vmax.f32 %v398_v28, %v400_v21 }
  0x4a   : > { %v403_v30 = vmax.f32 %v401_v29, %v402_v22 }
  0x4c   : > { %404 = vmax.xlane.f32.xlu0 %v403_v30 }
  0xd1   : > { %v281_v23 = vpop.xlane.xlu0 %280 }
  0xd2   : > { %v282_v31 = vrot.slane %v281_v23, 4 }
  0xd4   : > { %v283_v32 = vmin.f32 %v281_v23, %v282_v31 }
  0xd6   : > { %v284_v33 = vrot.slane %v283_v32, 2 }
  0xd8   : > { %v285_v34 = vmin.f32 %v283_v32, %v284_v33 }
  0xd9   : > { %v405_v24 = vpop.xlane.xlu0 %404 }
  0xda   : > { %v406_v35 = vrot.slane %v405_v24, 4  ;;  %v286_v36 = vrot.slane %v285_v34, 1 }
  0xdc   : > { %v407_v25 = vmax.f32 %v405_v24, %v406_v35  ;;  %v287_v37 = vmin.f32 %v285_v34, %v286_v36 }
  0xde   : > { %v408_v26 = vrot.slane %v407_v25, 2  ;;  %562 = vpush %v287_v37 }
  0xe0   : > { %v409_v27 = vmax.f32 %v407_v25, %v408_v26 }
  0xe2   : > { %v410_v38 = vrot.slane %v409_v27, 1 }
  0xe4   : > { %v411_v39 = vmax.f32 %v409_v27, %v410_v38 }
  0xe6   : > { %564 = vpush %v411_v39 }
 0x10f   : > { %s563_s27 = spop %562 }
 0x117   : > { %s565_s28 = spop %564 }
 0x118   : > { %s413_s29 = ssub.f32 %s565_s28, %s563_s27 }
 0x11a   : > { %s416_s30 = smul.f32 0.003921569, %s413_s29 }
 0x11c   : > { %s417_s3 = smax.f32 %s711_s2, %s416_s30 }
 0x11d   : > { %v418_v40 = vstv %s417_s3  ;;  %434 = sst [smem:[#allocation4]] %s417_s3 }
 0x11e   : > { %620 = vrcp.f32 %v418_v40 }
 0x128   : > { %v621_v41 = vpop.eup %620 }
 0x129   : > { %566 = vpush %v621_v41 }
 0x15a   : > { %s567_s4 = spop %566 }
 0x15b   : > { %s421_s5 = smul.f32 %s567_s4, %s563_s27 }
 0x15d   : > { %s422_s12 = scvt.f32.s32 %s421_s5  ;;  %s427_s13 = sand.u32 2147483647, %s421_s5 }
 0x15e   : > { %s425_s15 = sand.u32 2147483648, %s421_s5  ;;  %p428_p3 = scmp.lt.f32.partialorder %s427_s13, 2.1474836e+09 }
 0x15f   : > { %s423_s14 = scvt.s32.f32 %s422_s12 }
 0x161   : > { %s424_s16 = sand.u32 2147483647, %s423_s14 }
 0x162   : > { %s426_s17 = sor.u32 %s425_s15, %s424_s16 }
 0x163   : > { %s873_s17 = smov (!%p428_p3, %s426_s17), %s421_s5 }
 0x164   : > { %s430_s18 = ssub.f32 -128.0, %s873_s17 }
 0x166   : > { %s431_s20 = smax.f32 %s712_s19, %s430_s18 }
 0x167   : > { %s432_s22 = smin.f32 %s713_s21, %s431_s20 }
 0x168   : > { %436 = sst [smem:[#allocation4 + $0x1]] %s432_s22 }
 0x169 PF: > { %p556_p4 = scmp.ne.s32.totalorder %s700_s6, 1 }
 0x16a   : > { %s441_s23 = sld [smem:[#allocation4]] (!%p556_p4)  ;;  %s557_s24 = sld [smem:[#allocation4 + $0x1]] (!%p556_p4)  ;;  %v443_v43 = vld [vmem:[#allocation5] sm:$0xff] (!%p556_p4)  ;;  %v444_v44 = vld [vmem:[#allocation5 + $0x8] sm:$0xff] (!%p556_p4) }
 0x16b   : > { %440 = sbr.rel (%p556_p4) target bundleno = 395 (0x18b), region = 48 }
 0x170   : > { %v445_v42 = vstv (!%p556_p4), %s441_s23  ;;  %v449_v46 = vstv (!%p556_p4), %s557_s24 }
 0x171   : > { %622 = vrcp.f32 (!%p556_p4), %v445_v42 }
 0x17b   : > { %v623_v45 = vpop.eup %622 }
 0x17c   : > { %v447_v47 = vmul.f32 %v623_v45, %v443_v43  ;;  %v448_v48 = vmul.f32 %v623_v45, %v444_v44 }
 0x17e   : > { %v450_v49 = vadd.f32 %v449_v46, %v447_v47  ;;  %v451_v50 = vadd.f32 %v449_v46, %v448_v48 }
 0x180   : > { %v568_v51 = vround.rtne.f32 %v450_v49  ;;  %v569_v52 = vround.rtne.f32 %v451_v50 }
 0x182   : > { %v454_v53 = vmax.f32 %v568_v51, -128.0  ;;  %v455_v54 = vmax.f32 %v569_v52, -128.0 }
 0x184   : > { %v456_v55 = vmin.f32 %v454_v53, 127.0  ;;  %v457_v56 = vmin.f32 %v455_v54, 127.0 }
 0x186   : > { %v458_v57 = vsub.f32 %v456_v55, %v449_v46  ;;  %v459_v58 = vsub.f32 %v457_v56, %v449_v46 }
 0x188   : > { %v460_v59 = vmul.f32 %v458_v57, %v445_v42  ;;  %v461_v60 = vmul.f32 %v459_v58, %v445_v42 }
 0x18a   : > { %462 = vst [vmem:[#allocation8] sm:$0xff] %v460_v59  ;;  %463 = vst [vmem:[#allocation8 + $0x8] sm:$0xff] %v461_v60 }
 0x18b PF: > { %p823_p6 = scmp.eq.s32.totalorder %s549_s9, 1  ;;  %s714_s25 = smov [#allocation8]  }
 0x18c   : > { %s480_s26 = sshll.u32 %s714_s25, 4  ;;  %s481_s26 = int_to_ptr.vmem [resolvable:$true] %s480_s26 }
 0x18d   : > { %s652_s27 = scalar_lea.vmem %s481_s26, 256  ;;  %s658_s28 = scalar_lea.vmem %s481_s26, 512 }
 0x18e   : > { %p653_p10 = scmp.ne.s32.totalorder %s481_s26, %s652_s27  ;;  %p659_p13 = scmp.lt.s32.totalorder %s481_s26, %s481_s26 }
 0x18f   : > { %p660_p0 = scmp.lt.s32.totalorder %s658_s28, %s652_s27 }
 0x190   : > { %p654_p11 = pnand %p653_p10, %p823_p6 }
 0x191   : > { %p661_p1 = por %p660_p0, %p659_p13 }
 0x192   : > { %p655_p12 = pneg %p654_p11 }
 0x194   : > { %p662_p2 = pnand %p661_p1, %p655_p12 }
 0x196   : > { %665 = shalt.err (!%p662_p2)
}
 0x197   : > { %s666_s30 = scalar_lea.hbm %s858_s1, 256 }
 0x198   : > { %p667_p5 = scmp.ne.s32.totalorder %s858_s1, %s666_s30  ;;  %p672_p8 = scmp.lt.u32.totalorder %s666_s30, %s858_s1 }
 0x19a   : > { %p668_p7 = pnand %p667_p5, %p823_p6 }
 0x19c   : > { %p669_p9 = pneg %p668_p7 }
 0x19e   : > { %p674_p3 = pnand %p672_p8, %p669_p9 }
 0x1a0   : > { %677 = shalt.err (!%p674_p3)
}
 0x1a1   : > { %575 = dma.vmem_to_hbm [thread:$0]  (%p823_p6), %s481_s26, 256, %s858_s1, [#allocation7]  }
 0x1a2 PF: > { %p589_p4 = scmp.ge.s32.totalorder %s708_s8, 2  ;;  %p590_p10 = scmp.eq.s32.totalorder %s550_s10, 1 }
 0x1a4   : > { %p583_p11 = pnand %p590_p10, %p589_p4 }
 0x1a6   : > { %695 = dma.done.wait (!%p583_p11), [#allocation7], 256  }
 0x1a7   : > { %697 = vsyncadd (!%p583_p11), [#allocation7], 4294967040  ;;  %s15_s8 = sadd.s32 1, %s708_s8   ;;  %s868_s6 = smov %s704_s7 }
 0x1a8   : > { %p12_p12 = scmp.ge.s32.totalorder %s15_s8, 4   ;;  %s869_s7 = smov %s871_s11 }
 0x1aa   :  { %14 = sbr.rel (!%p12_p12) target bundleno = 4 (0x4), region = 84 }
 0x1b1   :  { %498 = vsyncpa [#allocation6], 1 }
 0x1b2   :  { %500 = vsyncpa [#allocation6 + $0x1], 1 }
 0x1b3   :  { %501 = vsyncpa [#allocation7], 1 }
 0x1b4   :  { %503 = vsyncpa [#allocation7 + $0x1], 1 }

</bundles_post_ra>
